<compile_context>
chip_gen: v5e
topology: v5e:2x2
jax: 0.10.0
libtpu: 0.0.40
codegen_flags: <defaults>
</compile_context>

<pallas_src>
import jax
import jax.numpy as jnp
from jax.experimental import pallas as pl
from jax.experimental.pallas import tpu as pltpu


def _dropout_linear_kernel(x_ref, w_ref, b_ref, o_ref):
    # Dropout(p=0.0) is the identity -> matmul (MXU) + bias add (VPU).
    acc = jnp.dot(x_ref[...], w_ref[...], preferred_element_type=jnp.float32)
    o_ref[...] = (acc + b_ref[...]).astype(o_ref.dtype)


def _pick_row_tile(M, target):
    """Pick the largest multiple-of-8 tile <= target that divides M (no row pad).
    Falls back to (rounded-up tile, pad=True) when no such divisor exists."""
    target = min(target, M)
    t = (target // 8) * 8
    while t >= 8:
        if M % t == 0:
            return t, False
        t -= 8
    t = max(8, ((min(target, M) + 7) // 8) * 8)
    return t, True


def dropout_linear_prepared(x, w_t, b2d, *, tm=784, compute_dtype=None):
    """x: [B, H, W, C]; w_t: [C, N] (already transposed); b2d: [1, N] -> [B, H, W, N]."""
    B, H, W, C = x.shape
    N = w_t.shape[1]
    M = B * H * W

    tm, need_pad = _pick_row_tile(M, tm)
    grid_m = pl.cdiv(M, tm)
    M_pad = grid_m * tm

    x2d = x.reshape(M, C)
    if compute_dtype is not None:
        x2d = x2d.astype(compute_dtype)
        w_t = w_t.astype(compute_dtype)
    if need_pad and M_pad != M:
        # Fallback only: for the module's shapes tm divides M exactly.
        x2d = jnp.pad(x2d, ((0, M_pad - M), (0, 0)))

    out_itemsize = jnp.dtype(x.dtype).itemsize
    cost = pl.CostEstimate(
        flops=2 * M_pad * C * N,
        transcendentals=0,
        bytes_accessed=(x2d.size * x2d.dtype.itemsize
                        + w_t.size * w_t.dtype.itemsize
                        + b2d.size * b2d.dtype.itemsize
                        + M_pad * N * out_itemsize),
    )

    out2d = pl.pallas_call(
        _dropout_linear_kernel,
        out_shape=jax.ShapeDtypeStruct((M_pad, N), x.dtype),
        grid_spec=pltpu.PrefetchScalarGridSpec(
            num_scalar_prefetch=0,
            grid=(grid_m,),
            in_specs=[
                pl.BlockSpec((tm, C), lambda i: (i, 0)),   # row tile of x
                pl.BlockSpec((C, N), lambda i: (0, 0)),    # full weight, resident
                pl.BlockSpec((1, N), lambda i: (0, 0)),    # bias row
            ],
            out_specs=pl.BlockSpec((tm, N), lambda i: (i, 0)),
        ),
        compiler_params=pltpu.CompilerParams(
            dimension_semantics=("parallel",),
        ),
        cost_estimate=cost,
    )(x2d, w_t, b2d)

    if M_pad != M:
        out2d = out2d[:M]
    return out2d.reshape(B, H, W, N)


def make_dropout_linear(weight, bias, *, tm=784, compute_dtype=None):
    """Hoist parameter-side prep (transpose / reshape / optional cast) out of the
    per-call path; returns a jitted apply(x) for this parameter set."""
    # TODO(synk): Dropout with p>0 (training-mode RNG mask) is not implemented;
    # the module uses p=0.0, which is the identity.
    w_t = jnp.asarray(weight).T              # (C, N) contraction-friendly layout
    b2d = jnp.asarray(bias).reshape(1, -1)   # (1, N); stays f32 (added to f32 acc)
    if compute_dtype is not None:
        w_t = w_t.astype(compute_dtype)

    def apply(x):
        return dropout_linear_prepared(x, w_t, b2d, tm=tm, compute_dtype=compute_dtype)

    return jax.jit(apply)


if __name__ == "__main__":
    key = jax.random.PRNGKey(0)
    kx, kw, kb = jax.random.split(key, 3)

    # Small-shape version of the module's forward: Linear(384 -> 96) over [B, H, W, 384].
    B, Hs, Ws, C, N = 1, 16, 16, 384, 96
    x = jax.random.normal(kx, (B, Hs, Ws, C), dtype=jnp.float32)

    # PyTorch Linear default init: U(-1/sqrt(fan_in), 1/sqrt(fan_in)).
    bound = 1.0 / (C ** 0.5)
    weight = jax.random.uniform(kw, (N, C), minval=-bound, maxval=bound, dtype=jnp.float32)
    bias = jax.random.uniform(kb, (N,), minval=-bound, maxval=bound, dtype=jnp.float32)

    # tm=64 on M=256 rows -> 4 grid steps, exercising the pipelined multi-step path.
    apply_fn = make_dropout_linear(weight, bias, tm=64)
    out = apply_fn(x)
    jax.block_until_ready(out)

    # Reference check in plain JAX (dropout p=0 is identity).
    ref = jnp.einsum("bhwc,nc->bhwn", x, weight) + bias
    assert out.shape == (B, Hs, Ws, N)
    assert jnp.allclose(out, ref, atol=1e-4, rtol=1e-4)

    print("KERNEL_OK")
</pallas_src>

<mosaic_0001>
module attributes {stable_mosaic.version = 11 : i64} {
  func.func @_dropout_linear_kernel(%arg0: i32, %arg1: memref<64x384xf32, #tpu.memory_space<vmem>>, %arg2: memref<384x96xf32, #tpu.memory_space<vmem>>, %arg3: memref<1x96xf32, #tpu.memory_space<vmem>>, %arg4: memref<64x96xf32, #tpu.memory_space<vmem>>) attributes {dimension_semantics = [#tpu.dimension_semantics<parallel>], iteration_bounds = array<i64: 4>, scalar_prefetch = 0 : i64, scratch_operands = 0 : i64, tpu.core_type = #tpu.core_type<tc>, window_params = [{transform_indices = @transform_0, window_bounds = array<i64: 64, 384>}, {pipeline_mode = #tpu.pipeline_mode<synchronous>, transform_indices = @transform_1, window_bounds = array<i64: 384, 96>}, {pipeline_mode = #tpu.pipeline_mode<synchronous>, transform_indices = @transform_2, window_bounds = array<i64: 1, 96>}, {transform_indices = @transform_3, window_bounds = array<i64: 64, 96>}]} {
    %c0 = arith.constant 0 : index
    %c0_0 = arith.constant 0 : index
    %0 = vector.load %arg1[%c0, %c0_0] : memref<64x384xf32, #tpu.memory_space<vmem>>, vector<64x384xf32>
    %c0_1 = arith.constant 0 : index
    %c0_2 = arith.constant 0 : index
    %1 = vector.load %arg2[%c0_1, %c0_2] : memref<384x96xf32, #tpu.memory_space<vmem>>, vector<384x96xf32>
    %cst = arith.constant dense<0.000000e+00> : vector<64x96xf32>
    %2 = tpu.matmul %0, %1, %cst {dimension_numbers = #tpu.dot_dimension_numbers<[1], [0], [0], [1], [0, 0, 1, 1], [], []>} : vector<64x384xf32>, vector<384x96xf32>, vector<64x96xf32> -> vector<64x96xf32>
    %c0_3 = arith.constant 0 : index
    %c0_4 = arith.constant 0 : index
    %3 = vector.load %arg3[%c0_3, %c0_4] : memref<1x96xf32, #tpu.memory_space<vmem>>, vector<1x96xf32>
    %4 = vector.broadcast %3 : vector<1x96xf32> to vector<64x96xf32>
    %5 = arith.addf %2, %4 : vector<64x96xf32>
    %c0_5 = arith.constant 0 : index
    %c0_6 = arith.constant 0 : index
    %6 = vector.load %arg4[%c0_5, %c0_6] : memref<64x96xf32, #tpu.memory_space<vmem>>, vector<64x96xf32>
    tpu.vector_store %arg4[%c0_5, %c0_6], %5 {strides = array<i32>} : memref<64x96xf32, #tpu.memory_space<vmem>>, vector<64x96xf32>,
    return
  }
  func.func @transform_0(%arg0: i32) -> (i32, i32) {
    %c0_i32 = arith.constant 0 : i32
    %c0_i32_0 = arith.constant 0 : i32
    return %arg0, %c0_i32 : i32, i32
  }
  func.func @transform_1(%arg0: i32) -> (i32, i32) {
    %c0_i32 = arith.constant 0 : i32
    %c0_i32_0 = arith.constant 0 : i32
    %c0_i32_1 = arith.constant 0 : i32
    return %c0_i32, %c0_i32_0 : i32, i32
  }
  func.func @transform_2(%arg0: i32) -> (i32, i32) {
    %c0_i32 = arith.constant 0 : i32
    %c0_i32_0 = arith.constant 0 : i32
    %c0_i32_1 = arith.constant 0 : i32
    return %c0_i32, %c0_i32_0 : i32, i32
  }
  func.func @transform_3(%arg0: i32) -> (i32, i32) {
    %c0_i32 = arith.constant 0 : i32
    %c0_i32_0 = arith.constant 0 : i32
    return %arg0, %c0_i32 : i32, i32
  }
}

</mosaic_0001>

<bundles_post_ra>
// kernel: apply.1
= control target key start
LH: loop header
LB: loop body
LE: loop exit
PB: predicated region body
PF: predicated region fallthrough
CT: control target
= control target key end

     0   :  { %8 = vsyncpa [#allocation3], 0  ;;  %s1037_s0 = inlined_call_operand.hbm [shape: f32[256,384], index: 0, kind: input, shape index: {}]   ;;  %s1038_s1 = inlined_call_operand.hbm [shape: f32[384,96], index: 1, kind: input, shape index: {}]   ;;  %s1039_s2 = inlined_call_operand.vmem [shape: f32[1,96], index: 2, kind: input, shape index: {}]   ;;  %s1040_s3 = inlined_call_operand.hbm [shape: f32[256,96], index: 3, kind: output, shape index: {}]  }
   0x1   :  { %10 = vsyncpa [#allocation3 + $0x1], 0 }
   0x2   :  { %11 = vsyncpa [#allocation6], 0 }
   0x3   :  { %12 = vsyncpa [#allocation4], 0 }
   0x4   :  { %14 = vsyncpa [#allocation4 + $0x1], 0  ;;  %s792_s12 = smov 0   ;;  %s794_s13 = smov 0  }
   0x5   :  { %s796_s14 = smov 0   ;;  %s798_s15 = smov 0  }
   0x6 LB: > { %s813_s16 = sadd.s32 4294967295, %s763_s15   ;;  %s518_s17 = sadd.s32 4294967294, %s763_s15   ;;  %s763_s15 = sphi %s798_s15, %s1049_s15   ;;  %s759_s14 = sphi %s796_s14, %s1048_s14   ;;  %s755_s13 = sphi %s794_s13, %s1047_s13   ;;  %s751_s12 = sphi %s792_s12, %s1046_s12  }
   0x7   : > { %p40_p0 = scmp.ne.s32.totalorder %s755_s13, %s751_s12  ;;  %p41_p1 = scmp.eq.s32.totalorder %s813_s16, 0 }
   0x8   : > { %p106_p2 = scmp.eq.s32.totalorder %s813_s16, 3  ;;  %p112_p3 = scmp.eq.s32.totalorder %s518_s17, 3 }
   0x9   : > { %p822_p4 = por %p41_p1, %p40_p0  ;;  %p519_p5 = scmp.ge.s32.totalorder %s763_s15, 1 }
   0xa   : > { %p827_p6 = por %p112_p3, %p40_p0  ;;  %p119_p7 = scmp.lt.s32.totalorder %s763_s15, 5 }
   0xb   : > { %s130_s22 = sshll.u32 %s1038_s1, 4  ;;  %s765_s24 = smov [#allocation5]   ;;  %s131_s22 = int_to_ptr.hbm [resolvable:$true] %s130_s22 }
   0xc   : > { %p835_p8 = pnand %p519_p5, %p119_p7  ;;  %s132_s25 = sshll.u32 %s765_s24, 4  ;;  %s133_s25 = int_to_ptr.vmem [resolvable:$true] %s132_s25 }
   0xd   : > { %s844_s26 = sadd.s32 1, %s763_s15   ;;  %s766_s27 = smov 128  }
   0xe   : > { %p577_p9 = pneg %p835_p8  ;;  %s767_s28 = smov 8  }
   0xf   : > { %s24_s29 = ssub.s32 %s763_s15, %s844_s26  ;;  %s27_s30 = sadd.s32 1, %s759_s14 }
  0x10   : > { %p578_p10 = pnand %p577_p9, %p41_p1  ;;  %p25_p11 = scmp.eq.s32.totalorder %s24_s29, 0 }
  0x11   : > { %p34_p12 = scmp.ne.s32.totalorder %s759_s14, %s755_s13  ;;  %p35_p13 = scmp.eq.s32.totalorder %s763_s15, 0 }
  0x12   : > { %580 = dma.hbm_to_vmem [thread:$0]  (!%p578_p10), %s131_s22, 6144, %s133_s25, [#allocation6], %s766_s27, %s766_s27, %s767_s28  }
  0x13   : > { %p590_p0 = scmp.lt.s32.totalorder %s763_s15, 4  ;;  %p36_p3 = por %p35_p13, %p34_p12 }
  0x14   : > { %s854_s4 = scalar_select %p25_p11, %s759_s14, %s27_s30  }
  0x15   : > { %p858_p5 = por %p106_p2, %p34_p12  ;;  %s149_s6 = sand.u32 1, %s759_s14  }
  0x16   : > { %s567_s7 = smul.u32 192, %s763_s15  ;;  %p867_p7 = pnand %p590_p0, %p36_p3 }
  0x17   : > { %s566_s8 = smul.u32 192, %s149_s6  ;;  %s150_s24 = scalar_lea.sflag [#allocation3], %s149_s6 }
  0x18   : > { %s159_s11 = scalar_lea.hbm %s1037_s0, %s567_s7  ;;  %p667_p9 = pneg %p867_p7 }
  0x19   : > { %s160_s20 = sshll.u32 %s159_s11, 4  ;;  %s153_s21 = scalar_lea.vmem [#allocation2], %s566_s8  ;;  %s161_s20 = int_to_ptr.hbm [resolvable:$true] %s160_s20 }
  0x1a   : > { %s162_s22 = sshll.u32 %s153_s21, 4  ;;  %s663_s25 = sshra.s32 %s161_s20, 4  ;;  %s163_s22 = int_to_ptr.vmem [resolvable:$true] %s162_s22  ;;  %s664_s25 = int_to_ptr.hbm [resolvable:$true] %s663_s25 }
  0x1b   : > { %s665_s27 = scalar_lea.hbm %s664_s25, 192  ;;  %s670_s30 = scalar_lea.hbm %s1037_s0, 768 }
  0x1c   : > { %p666_p2 = scmp.ne.s32.totalorder %s664_s25, %s665_s27  ;;  %p671_p12 = scmp.lt.s32.totalorder %s664_s25, %s1037_s0 }
  0x1d   : > { %p672_p13 = scmp.lt.s32.totalorder %s670_s30, %s665_s27 }
  0x1e   : > { %p668_p10 = pnand %p667_p9, %p666_p2 }
  0x1f   : > { %p673_p0 = por %p672_p13, %p671_p12 }
  0x20   : > { %p669_p11 = pneg %p668_p10 }
  0x22   : > { %p674_p3 = pnand %p673_p0, %p669_p11 }
  0x24   : > { %677 = shalt.err (!%p674_p3)
}
  0x25   : > { %s768_s6 = smov 384   ;;  %s769_s8 = smov 24  }
  0x26   : > { %584 = dma.hbm_to_vmem [thread:$0]  (!%p867_p7), %s161_s20, 3072, %s163_s22, %s150_s24, %s768_s6, %s768_s6, %s769_s8  }
  0x27   : > { %174 = sbr.rel (%p835_p8) target bundleno = 274 (0x112), region = 32  ;;  %s884_s10 = sand.u32 (!%p835_p8), 1, %s755_s13  }
  0x28   : > { %s568_s11 = smul.u32 (!%p835_p8), 192, %s884_s10  ;;  %s177_s21 = scalar_lea.sflag (!%p835_p8), [#allocation3], %s884_s10 }
  0x2a   : > { %s888_s25 = scalar_lea.vmem (!%p835_p8), [#allocation2], %s568_s11 }
  0x2c   : > { %738 = dma.done.wait (%p822_p4), %s177_s21, 3072  }
  0x2d   : > { %740 = vsyncadd (%p822_p4), %s177_s21, 4294964224 }
  0x2e   : > { %742 = dma.done.wait (%p41_p1), [#allocation6], 6144  }
  0x2f   : > { %744 = vsyncadd (%p41_p1), [#allocation6], 4294961152  ;;  %v898_v0 = vld [vmem:[#allocation5 + $0xf8] sm:$0xff]  ;;  %v901_v3 = vld [vmem:[#allocation5 + $0xf0] sm:$0xff]  ;;  %s527_s17 = sshll.u32 %s884_s10, 6  ;;  %vm410_vm0 = vcmask 785408  }
  0x30   : > { %v282_v1 = vld [vmem:[#allocation5 + $0x178] sm:$0xff]  ;;  %328 = vmatpush.msra.mxu1 %v898_v0  ;;  %v281_v4 = vld [vmem:[#allocation5 + $0x170] sm:$0xff]  ;;  %v903_v6 = vld [vmem:[#allocation5 + $0xe8] sm:$0xff]  ;;  %s986_s20 = scalar_lea.vmem [#allocation7], %s527_s17  ;;  %s533_s22 = sshll.u32 %s813_s16, 6 }
  0x31   : > { %v250_v2 = vld [vmem:[#allocation5 + $0x78] sm:$0xff]  ;;  %369 = vmatpush.msra.mxu2 %v282_v1  ;;  %v249_v5 = vld [vmem:[#allocation5 + $0x70] sm:$0xff]  ;;  %v280_v7 = vld [vmem:[#allocation5 + $0x168] sm:$0xff]  ;;  %s431_s28 = scalar_lea.hbm %s1040_s3, %s533_s22  ;;  %s432_s29 = sshll.u32 %s986_s20, 4  ;;  %s433_s29 = int_to_ptr.vmem [resolvable:$true] %s432_s29 }
  0x32   : > { %287 = vmatpush.msra.mxu0 %v250_v2  ;;  %534 = vmatpush.msra.mxu3 %v250_v2  ;;  %v248_v8 = vld [vmem:[#allocation5 + $0x68] sm:$0xff]  ;;  %v906_v9 = vld [vmem:[#allocation5 + $0xe0] sm:$0xff]  ;;  %v909_v12 = vld [vmem:[#allocation5 + $0xd8] sm:$0xff]  ;;  %s434_s30 = sshll.u32 %s431_s28, 4  ;;  %s420_s16 = scalar_lea.sflag [#allocation4], %s884_s10  ;;  %s435_s30 = int_to_ptr.hbm [resolvable:$true] %s434_s30 }
  0x33   : > { %329 = vmatpush.msra.mxu1 %v901_v3  ;;  %370 = vmatpush.msra.mxu2 %v281_v4  ;;  %v279_v10 = vld [vmem:[#allocation5 + $0x160] sm:$0xff]  ;;  %v278_v13 = vld [vmem:[#allocation5 + $0x158] sm:$0xff]  ;;  %v912_v15 = vld [vmem:[#allocation5 + $0xd0] sm:$0xff]  ;;  %s707_s7 = sshra.s32 %s435_s30, 4  ;;  %s713_s11 = scalar_lea.hbm %s1040_s3, 256  ;;  %s708_s7 = int_to_ptr.hbm [resolvable:$true] %s707_s7 }
  0x34   : > { %288 = vmatpush.msra.mxu0 %v249_v5  ;;  %535 = vmatpush.msra.mxu3 %v249_v5  ;;  %v247_v11 = vld [vmem:[#allocation5 + $0x60] sm:$0xff]  ;;  %v246_v14 = vld [vmem:[#allocation5 + $0x58] sm:$0xff]  ;;  %v277_v16 = vld [vmem:[#allocation5 + $0x150] sm:$0xff]  ;;  %s709_s9 = scalar_lea.hbm %s708_s7, 64  ;;  %p714_p7 = scmp.lt.s32.totalorder %s708_s7, %s1040_s3 }
  0x35   : > { %330 = vmatpush.msra.mxu1 %v903_v6  ;;  %371 = vmatpush.msra.mxu2 %v280_v7  ;;  %v245_v17 = vld [vmem:[#allocation5 + $0x50] sm:$0xff]  ;;  %v915_v18 = vld [vmem:[#allocation5 + $0xc8] sm:$0xff]  ;;  %v918_v21 = vld [vmem:[#allocation5 + $0xc0] sm:$0xff]  ;;  %p710_p1 = scmp.ne.s32.totalorder %s708_s7, %s709_s9  ;;  %p715_p2 = scmp.lt.s32.totalorder %s713_s11, %s709_s9 }
  0x36   : > { %289 = vmatpush.msra.mxu0 %v248_v8  ;;  %536 = vmatpush.msra.mxu3 %v248_v8  ;;  %v276_v19 = vld [vmem:[#allocation5 + $0x148] sm:$0xff]  ;;  %v275_v22 = vld [vmem:[#allocation5 + $0x140] sm:$0xff]  ;;  %v921_v24 = vld [vmem:[#allocation5 + $0xb8] sm:$0xff] }
  0x37   : > { %331 = vmatpush.msra.mxu1 %v906_v9  ;;  %372 = vmatpush.msra.mxu2 %v279_v10  ;;  %v244_v20 = vld [vmem:[#allocation5 + $0x48] sm:$0xff]  ;;  %v243_v23 = vld [vmem:[#allocation5 + $0x40] sm:$0xff]  ;;  %v274_v25 = vld [vmem:[#allocation5 + $0x138] sm:$0xff]  ;;  %p711_p4 = pnand %p710_p1, %p858_p5  ;;  %p716_p9 = por %p715_p2, %p714_p7 }
  0x38   : > { %290 = vmatpush.msra.mxu0 %v247_v11  ;;  %537 = vmatpush.msra.mxu3 %v247_v11  ;;  %v242_v26 = vld [vmem:[#allocation5 + $0x38] sm:$0xff]  ;;  %v924_v27 = vld [vmem:[#allocation5 + $0xb0] sm:$0xff]  ;;  %v927_v30 = vld [vmem:[#allocation5 + $0xa8] sm:$0xff] }
  0x39   : > { %332 = vmatpush.msra.mxu1 %v909_v12  ;;  %373 = vmatpush.msra.mxu2 %v278_v13  ;;  %v273_v28 = vld [vmem:[#allocation5 + $0x130] sm:$0xff]  ;;  %v272_v31 = vld [vmem:[#allocation5 + $0x128] sm:$0xff]  ;;  %v930_v33 = vld [vmem:[#allocation5 + $0xa0] sm:$0xff]  ;;  %p712_p8 = pneg %p711_p4 }
  0x3a   : > { %291 = vmatpush.msra.mxu0 %v246_v14  ;;  %538 = vmatpush.msra.mxu3 %v246_v14  ;;  %v241_v29 = vld [vmem:[#allocation5 + $0x30] sm:$0xff]  ;;  %v240_v32 = vld [vmem:[#allocation5 + $0x28] sm:$0xff]  ;;  %v271_v34 = vld [vmem:[#allocation5 + $0x120] sm:$0xff] }
  0x3b   : > { %333 = vmatpush.msra.mxu1 %v912_v15  ;;  %374 = vmatpush.msra.mxu2 %v277_v16  ;;  %v239_v35 = vld [vmem:[#allocation5 + $0x20] sm:$0xff]  ;;  %v933_v36 = vld [vmem:[#allocation5 + $0x98] sm:$0xff]  ;;  %v936_v39 = vld [vmem:[#allocation5 + $0x90] sm:$0xff]  ;;  %p717_p10 = pnand %p716_p9, %p712_p8 }
  0x3c   : > { %292 = vmatpush.msra.mxu0 %v245_v17  ;;  %539 = vmatpush.msra.mxu3 %v245_v17  ;;  %v270_v37 = vld [vmem:[#allocation5 + $0x118] sm:$0xff]  ;;  %v269_v40 = vld [vmem:[#allocation5 + $0x110] sm:$0xff]  ;;  %v939_v42 = vld [vmem:[#allocation5 + $0x88] sm:$0xff] }
  0x3d   : > { %334 = vmatpush.msra.mxu1 %v915_v18  ;;  %375 = vmatpush.msra.mxu2 %v276_v19  ;;  %v238_v38 = vld [vmem:[#allocation5 + $0x18] sm:$0xff]  ;;  %v237_v41 = vld [vmem:[#allocation5 + $0x10] sm:$0xff]  ;;  %v268_v43 = vld [vmem:[#allocation5 + $0x108] sm:$0xff] }
  0x3e   : > { %293 = vmatpush.msra.mxu0 %v244_v20  ;;  %540 = vmatpush.msra.mxu3 %v244_v20  ;;  %v236_v44 = vld [vmem:[#allocation5 + $0x8] sm:$0xff]  ;;  %v251_v45 = vld [vmem:[#allocation5 + $0x80] sm:$0xff]  ;;  %v213_v48 = vld [vmem:[%s888_s25 + $0x10] sm:$0xff] }
  0x3f   : > { %335 = vmatpush.msra.mxu1 %v918_v21  ;;  %376 = vmatpush.msra.mxu2 %v275_v22  ;;  %v267_v46 = vld [vmem:[#allocation5 + $0x100] sm:$0xff]  ;;  %v212_v47 = vld [vmem:[%s888_s25 + $0x8] sm:$0xff]  ;;  %v229_v51 = vld [vmem:[%s888_s25 + $0x90] sm:$0xff] }
  0x40   : > { %294 = vmatpush.msra.mxu0 %v243_v23  ;;  %541 = vmatpush.msra.mxu3 %v243_v23  ;;  %v235_v49 = vld [vmem:[#allocation5] sm:$0xff]  ;;  %v216_v53 = vld [vmem:[%s888_s25 + $0x28] sm:$0xff]  ;;  %v214_v54 = vld [vmem:[%s888_s25 + $0x18] sm:$0xff] }
  0x41   : > { %336 = vmatpush.msra.mxu1 %v921_v24  ;;  %377 = vmatpush.msra.mxu2 %v274_v25  ;;  %v211_v50 = vld [vmem:[%s888_s25] sm:$0xff]  ;;  %v232_v55 = vld [vmem:[%s888_s25 + $0xa8] sm:$0xff]  ;;  %v218_v56 = vld [vmem:[%s888_s25 + $0x38] sm:$0xff] }
  0x42   : > { %295 = vmatpush.msra.mxu0 %v242_v26  ;;  %542 = vmatpush.msra.mxu3 %v242_v26  ;;  %v215_v52 = vld [vmem:[%s888_s25 + $0x20] sm:$0xff]  ;;  %v217_v58 = vld [vmem:[%s888_s25 + $0x30] sm:$0xff]  ;;  %v222_v60 = vld [vmem:[%s888_s25 + $0x58] sm:$0xff] }
  0x43   : > { %337 = vmatpush.msra.mxu1 %v924_v27  ;;  %378 = vmatpush.msra.mxu2 %v273_v28  ;;  %v219_v57 = vld [vmem:[%s888_s25 + $0x40] sm:$0xff]  ;;  %v221_v59 = vld [vmem:[%s888_s25 + $0x50] sm:$0xff]  ;;  %v220_v61 = vld [vmem:[%s888_s25 + $0x48] sm:$0xff] }
  0x44   : > { %296 = vmatpush.msra.mxu0 %v241_v29  ;;  %543 = vmatpush.msra.mxu3 %v241_v29  ;;  %v224_v62 = vld [vmem:[%s888_s25 + $0x68] sm:$0xff]  ;;  %v225_v63 = vld [vmem:[%s888_s25 + $0x70] sm:$0xff]  ;;  %v227_v2 = vld [vmem:[%s888_s25 + $0x80] sm:$0xff] }
  0x45   : > { %338 = vmatpush.msra.mxu1 %v927_v30  ;;  %379 = vmatpush.msra.mxu2 %v272_v31  ;;  %v233_v1 = vld [vmem:[%s888_s25 + $0xb0] sm:$0xff]  ;;  %v226_v4 = vld [vmem:[%s888_s25 + $0x78] sm:$0xff]  ;;  %v632_v8 = vld [vmem:[%s1039_s2] ss:$0 sm:$0xff] }
  0x46   : > { %297 = vmatpush.msra.mxu0 %v240_v32  ;;  %544 = vmatpush.msra.mxu3 %v240_v32  ;;  %v230_v5 = vld [vmem:[%s888_s25 + $0x98] sm:$0xff] }
  0x47   : > { %339 = vmatpush.msra.mxu1 %v930_v33  ;;  %380 = vmatpush.msra.mxu2 %v271_v34  ;;  %v234_v7 = vld [vmem:[%s888_s25 + $0xb8] sm:$0xff] }
  0x48   : > { %298 = vmatpush.msra.mxu0 %v239_v35  ;;  %545 = vmatpush.msra.mxu3 %v239_v35 }
  0x49   : > { %340 = vmatpush.msra.mxu1 %v933_v36  ;;  %381 = vmatpush.msra.mxu2 %v270_v37 }
  0x4a   : > { %299 = vmatpush.msra.mxu0 %v238_v38  ;;  %546 = vmatpush.msra.mxu3 %v238_v38 }
  0x4b   : > { %341 = vmatpush.msra.mxu1 %v936_v39  ;;  %382 = vmatpush.msra.mxu2 %v269_v40 }
  0x4c   : > { %300 = vmatpush.msra.mxu0 %v237_v41  ;;  %547 = vmatpush.msra.mxu3 %v237_v41 }
  0x4d   : > { %342 = vmatpush.msra.mxu1 %v939_v42  ;;  %383 = vmatpush.msra.mxu2 %v268_v43 }
  0x4e   : > { %301 = vmatpush.msra.mxu0 %v236_v44  ;;  %548 = vmatpush.msra.mxu3 %v236_v44 }
  0x4f   : > { %343 = vmatpush.msra.mxu1 %v251_v45  ;;  %384 = vmatpush.msra.mxu2 %v267_v46 }
  0x50   : > { %344 = vmatmul.f32.vlgmr.msra.gmra.mxu1 %v212_v47  ;;  %385 = vmatmul.f32.vlgmr.msra.gmra.mxu2 %v213_v48 }
  0x51   : > { %302 = vmatpush.msra.mxu0 %v235_v49  ;;  %549 = vmatpush.msra.mxu3 %v235_v49 }
  0x52   : > { %303 = vmatmul.f32.vlgmr.msra.gmra.mxu0 %v211_v50  ;;  %321 = vmatmul.f32.vlgmr.msra.gmra.mxu3 %v229_v51 }
  0x53   : > { %550 = vmatpush.msrb.mxu3 %v898_v0  ;;  %v223_v0 = vld [vmem:[%s888_s25 + $0x60] sm:$0xff] }
  0x55   : > { %551 = vmatpush.msrb.mxu3 %v901_v3  ;;  %v228_v3 = vld [vmem:[%s888_s25 + $0x88] sm:$0xff] }
  0x57   : > { %552 = vmatpush.msrb.mxu3 %v903_v6  ;;  %v231_v6 = vld [vmem:[%s888_s25 + $0xa0] sm:$0xff] }
  0x58   : > { %347 = vmatmul.f32.gmra.mxu1 %v215_v52  ;;  %388 = vmatmul.f32.gmra.mxu2 %v216_v53 }
  0x59   : > { %553 = vmatpush.msrb.mxu3 %v906_v9 }
  0x5a   : > { %306 = vmatmul.f32.gmra.mxu0 %v214_v54  ;;  %324 = vmatmul.f32.gmra.mxu3 %v232_v55 }
  0x5b   : > { %554 = vmatpush.msrb.mxu3 %v909_v12 }
  0x5d   : > { %555 = vmatpush.msrb.mxu3 %v912_v15 }
  0x5f   : > { %556 = vmatpush.msrb.mxu3 %v915_v18 }
  0x60   : > { %350 = vmatmul.f32.gmra.mxu1 %v218_v56  ;;  %391 = vmatmul.f32.gmra.mxu2 %v219_v57 }
  0x61   : > { %557 = vmatpush.msrb.mxu3 %v918_v21 }
  0x62   : > { %309 = vmatmul.f32.gmra.mxu0 %v217_v58 }
  0x63   : > { %558 = vmatpush.msrb.mxu3 %v921_v24 }
  0x65   : > { %559 = vmatpush.msrb.mxu3 %v924_v27 }
  0x67   : > { %560 = vmatpush.msrb.mxu3 %v927_v30 }
  0x68   : > { %353 = vmatmul.f32.gmra.mxu1 %v221_v59  ;;  %394 = vmatmul.f32.gmra.mxu2 %v222_v60 }
  0x69   : > { %561 = vmatpush.msrb.mxu3 %v930_v33 }
  0x6a   : > { %312 = vmatmul.f32.gmra.mxu0 %v220_v61 }
  0x6b   : > { %562 = vmatpush.msrb.mxu3 %v933_v36 }
  0x6d   : > { %563 = vmatpush.msrb.mxu3 %v936_v39 }
  0x6f   : > { %564 = vmatpush.msrb.mxu3 %v939_v42 }
  0x70   : > { %356 = vmatmul.f32.gmra.mxu1 %v224_v62  ;;  %397 = vmatmul.f32.gmra.mxu2 %v225_v63 }
  0x71   : > { %565 = vmatpush.msrb.mxu3 %v251_v45 }
  0x72   : > { %315 = vmatmul.f32.gmra.mxu0 %v223_v0  ;;  %365 = vmatmul.f32.vlgmr.msrb.gmra.mxu3 %v233_v1 }
  0x78   : > { %359 = vmatmul.f32.gmra.mxu1 %v227_v2  ;;  %400 = vmatmul.f32.gmra.mxu2 %v228_v3 }
  0x7a   : > { %318 = vmatmul.f32.gmra.mxu0 %v226_v4 }
  0x80   : > { %362 = vmatmul.f32.gmra.mxu1 %v230_v5  ;;  %403 = vmatmul.f32.gmra.mxu2 %v231_v6 }
  0x88   : > { %406 = vmatmul.f32.gmra.mxu2 %v234_v7 }
  0xcd   : > { %v345_v9 = vpop.f32.mrf.mxu1 }
  0xcf   : > { %v304_v10 = vpop.f32.mrf.mxu0 }
  0xd0   : > { %v305_v11 = vadd.f32 %v632_v8, %v304_v10 }
  0xd2   : > { %v346_v12 = vadd.f32 %v345_v9, %v305_v11 }
  0xd3   : > { %v386_v13 = vpop.f32.mrf.mxu2 }
  0xd4   : > { %v387_v14 = vadd.f32 %v386_v13, %v346_v12 }
  0xd5   : > { %v348_v15 = vpop.f32.mrf.mxu1  ;;  %v322_v37 = vpop.f32.mrf.mxu3 }
  0xd6   : > { %411 = vst.msk [vmem:[%s986_s20] sm:$0xff] %vm410_vm0, %v387_v14  ;;  %v323_v48 = vadd.f32 %v632_v8, %v322_v37 }
  0xd7   : > { %v307_v16 = vpop.f32.mrf.mxu0 }
  0xd8   : > { %v308_v17 = vadd.f32 %v632_v8, %v307_v16 }
  0xda   : > { %v349_v18 = vadd.f32 %v348_v15, %v308_v17 }
  0xdb   : > { %v389_v19 = vpop.f32.mrf.mxu2 }
  0xdc   : > { %v390_v20 = vadd.f32 %v389_v19, %v349_v18 }
  0xdd   : > { %v351_v21 = vpop.f32.mrf.mxu1  ;;  %v325_v46 = vpop.f32.mrf.mxu3 }
  0xde   : > { %412 = vst.msk [vmem:[%s986_s20 + $0x8] sm:$0xff] %vm410_vm0, %v390_v20  ;;  %v326_v52 = vadd.f32 %v632_v8, %v325_v46 }
  0xdf   : > { %v310_v22 = vpop.f32.mrf.mxu0 }
  0xe0   : > { %v311_v23 = vadd.f32 %v632_v8, %v310_v22 }
  0xe2   : > { %v352_v24 = vadd.f32 %v351_v21, %v311_v23 }
  0xe3   : > { %v392_v25 = vpop.f32.mrf.mxu2 }
  0xe4   : > { %v393_v26 = vadd.f32 %v392_v25, %v352_v24 }
  0xe5   : > { %v354_v27 = vpop.f32.mrf.mxu1 }
  0xe6   : > { %413 = vst.msk [vmem:[%s986_s20 + $0x10] sm:$0xff] %vm410_vm0, %v393_v26 }
  0xe7   : > { %v313_v28 = vpop.f32.mrf.mxu0 }
  0xe8   : > { %v314_v29 = vadd.f32 %v632_v8, %v313_v28 }
  0xea   : > { %v355_v30 = vadd.f32 %v354_v27, %v314_v29 }
  0xeb   : > { %v395_v31 = vpop.f32.mrf.mxu2 }
  0xec   : > { %v396_v32 = vadd.f32 %v395_v31, %v355_v30 }
  0xed   : > { %v357_v33 = vpop.f32.mrf.mxu1 }
  0xee   : > { %414 = vst.msk [vmem:[%s986_s20 + $0x18] sm:$0xff] %vm410_vm0, %v396_v32 }
  0xef   : > { %v316_v34 = vpop.f32.mrf.mxu0 }
  0xf0   : > { %v317_v35 = vadd.f32 %v632_v8, %v316_v34 }
  0xf2   : > { %v358_v36 = vadd.f32 %v357_v33, %v317_v35 }
  0xf3   : > { %v398_v38 = vpop.f32.mrf.mxu2 }
  0xf4   : > { %v399_v39 = vadd.f32 %v398_v38, %v358_v36 }
  0xf5   : > { %v360_v40 = vpop.f32.mrf.mxu1  ;;  %v366_v53 = vpop.f32.mrf.mxu3 }
  0xf6   : > { %415 = vst.msk [vmem:[%s986_s20 + $0x20] sm:$0xff] %vm410_vm0, %v399_v39  ;;  %v367_v54 = vadd.f32 %v366_v53, %v326_v52 }
  0xf7   : > { %v319_v41 = vpop.f32.mrf.mxu0 }
  0xf8   : > { %v320_v42 = vadd.f32 %v632_v8, %v319_v41 }
  0xfa   : > { %v361_v43 = vadd.f32 %v360_v40, %v320_v42 }
  0xfb   : > { %v401_v44 = vpop.f32.mrf.mxu2 }
  0xfc   : > { %v402_v45 = vadd.f32 %v401_v44, %v361_v43 }
  0xfd   : > { %v363_v47 = vpop.f32.mrf.mxu1 }
  0xfe   : > { %416 = vst.msk [vmem:[%s986_s20 + $0x28] sm:$0xff] %vm410_vm0, %v402_v45  ;;  %v364_v49 = vadd.f32 %v363_v47, %v323_v48 }
 0x103   : > { %v404_v50 = vpop.f32.mrf.mxu2 }
 0x104   : > { %v405_v51 = vadd.f32 %v404_v50, %v364_v49 }
 0x106   : > { %417 = vst.msk [vmem:[%s986_s20 + $0x30] sm:$0xff] %vm410_vm0, %v405_v51 }
 0x10b   : > { %v407_v55 = vpop.f32.mrf.mxu2 }
 0x10c   : > { %v408_v56 = vadd.f32 %v407_v55, %v367_v54 }
 0x10e   : > { %418 = vst.msk [vmem:[%s986_s20 + $0x38] sm:$0xff] %vm410_vm0, %v408_v56 }
 0x10f   : > { %720 = shalt.err (!%p717_p10)
}
 0x110   : > { %s770_s10 = smov 128   ;;  %s771_s18 = smov 8  }
 0x111   : > { %575 = dma.vmem_to_hbm [thread:$0]  (%p858_p5), %s433_s29, 1024, %s435_s30, %s420_s16, %s770_s10, %s770_s10, %s771_s18  }
 0x112 PF: > { %p592_p11 = scmp.ge.s32.totalorder %s763_s15, 2  ;;  %s449_s23 = sand.u32 1, %s751_s12  }
 0x113   : > { %s450_s17 = scalar_lea.sflag [#allocation4], %s449_s23 }
 0x114   : > { %p586_p12 = pnand %p592_p11, %p827_p6 }
 0x116   : > { %p587_p13 = pneg %p586_p12 }
 0x118   : > { %746 = dma.done.wait (%p587_p13), %s450_s17, 1024  }
 0x119   : > { %748 = vsyncadd (%p587_p13), %s450_s17, 4294966272  ;;  %p17_p0 = scmp.ge.s32.totalorder %s844_s26, 6   ;;  %s1046_s12 = smov %s755_s13 }
 0x11a   : > { %s1047_s13 = smov %s759_s14  ;;  %s1048_s14 = smov %s854_s4 }
 0x11b   : > { %s1049_s15 = smov %s844_s26  ;;  %19 = sbr.rel (!%p17_p0) target bundleno = 6 (0x6), region = 81 }
 0x120   :  { %456 = vsyncpa [#allocation3], 1 }
 0x121   :  { %458 = vsyncpa [#allocation3 + $0x1], 1 }
 0x122   :  { %459 = vsyncpa [#allocation6], 1 }
 0x123   :  { %460 = vsyncpa [#allocation4], 1 }
 0x124   :  { %462 = vsyncpa [#allocation4 + $0x1], 1 }

</bundles_post_ra>
